<compile_context>
chip_gen: v5e
topology: v5e:2x2
jax: 0.10.0
libtpu: 0.0.40
codegen_flags: <defaults>
</compile_context>

<pallas_src>
import jax
import jax.numpy as jnp
from jax.experimental import pallas as pl
from jax.experimental.pallas import tpu as pltpu


def oivae_decoder_kernel(x_ref, wm_ref, bm_ref, wg_ref, gb_ref, recon_ref):
    dimX = recon_ref.shape[-1]
    inv_b = 1.0 / x_ref.shape[0]

    # za || zc = p @ [WM1^T | WM2^T] + [bM1 | bM2]   (single MXU push)
    z = jnp.dot(x_ref[...], wm_ref[...], preferred_element_type=jnp.float32)
    z = z + bm_ref[...]

    # g1 || g2 = (za || zc) @ blockdiag(WG1^T, WG2^T)   (single MXU push)
    # fcG biases omitted: exactly cancelled by training-mode BN mean subtraction.
    g = jnp.dot(z.astype(wg_ref.dtype), wg_ref[...],
                preferred_element_type=jnp.float32)

    # Fused BatchNorm1d over the concatenated features: per-column batch mean,
    # biased variance, eps=1e-5.  One-pass stats: var = E[g^2] - mean^2.
    mean = jnp.sum(g, axis=0, keepdims=True) * inv_b
    ex2 = jnp.sum(g * g, axis=0, keepdims=True) * inv_b
    var = ex2 - mean * mean
    gb = gb_ref[...]
    gamma = gb[0:1, :]
    beta = gb[1:2, :]
    gbn = (g - mean) * jax.lax.rsqrt(var + 1e-5) * gamma + beta

    # Per-row softmax (dim=1) within each head, then sum.
    def softmax_rows(s):
        m = jnp.max(s, axis=-1, keepdims=True)
        e = jnp.exp(s - m)
        return e / jnp.sum(e, axis=-1, keepdims=True)

    rea = softmax_rows(gbn[:, :dimX])
    rec = softmax_rows(gbn[:, dimX:])
    recon_ref[...] = (rea + rec).astype(recon_ref.dtype)


def pack_decoder_params(prm, matmul_dtype=jnp.float32):
    """One-time packing of PyTorch-layout params (hoisted out of the hot path).

    prm: wM1/wM2 [dimZ, dimZ], bM1/bM2 [dimZ], wG1/wG2 [dimX, dimZ],
         bG1/bG2 [dimX] (BN-cancelled, unused), g*/beta* [dimX] BN affine.
    """
    f32 = jnp.float32
    wm_cat = jnp.concatenate([jnp.asarray(prm["wM1"], f32).T,
                              jnp.asarray(prm["wM2"], f32).T], axis=1)
    bm_cat = jnp.concatenate([jnp.asarray(prm["bM1"], f32),
                              jnp.asarray(prm["bM2"], f32)]).reshape(1, -1)
    wg1t = jnp.asarray(prm["wG1"], f32).T
    wg2t = jnp.asarray(prm["wG2"], f32).T
    dimZ, dimX = wg1t.shape
    zpad = jnp.zeros((dimZ, dimX), f32)
    wg_bd = jnp.block([[wg1t, zpad], [zpad, wg2t]])          # [2*dimZ, 2*dimX]
    gb = jnp.stack([jnp.concatenate([jnp.asarray(prm["g1"], f32),
                                     jnp.asarray(prm["g2"], f32)]),
                    jnp.concatenate([jnp.asarray(prm["beta1"], f32),
                                     jnp.asarray(prm["beta2"], f32)])], axis=0)
    return {
        "wm": wm_cat.astype(matmul_dtype),
        "bm": bm_cat,
        "wg": wg_bd.astype(matmul_dtype),
        "gb": gb,
        "dimX": int(dimX),
    }


def oivae_decoder(p, packed):
    """p: [B, dimZ] float32. Returns recon: [B, dimX] float32."""
    B = p.shape[0]
    dimX = packed["dimX"]
    vmem = pl.BlockSpec(memory_space=pltpu.MemorySpace.VMEM)
    return pl.pallas_call(
        oivae_decoder_kernel,
        out_shape=jax.ShapeDtypeStruct((B, dimX), jnp.float32),
        in_specs=[vmem] * 5,
        out_specs=vmem,
    )(p.astype(packed["wm"].dtype), packed["wm"], packed["bm"],
      packed["wg"], packed["gb"])


def _init_linear(key, out_f, in_f):
    # PyTorch nn.Linear default init: U(-1/sqrt(in), 1/sqrt(in)).
    kw, kb = jax.random.split(key)
    bound = 1.0 / (in_f ** 0.5)
    w = jax.random.uniform(kw, (out_f, in_f), jnp.float32, -bound, bound)
    b = jax.random.uniform(kb, (out_f,), jnp.float32, -bound, bound)
    return w, b


def _reference(p, prm):
    # Pure-JAX mirror of the PyTorch forward (bn=True, training-mode BN, clf=False).
    def bn(z, g, b, eps=1e-5):
        m = jnp.mean(z, axis=0, keepdims=True)
        v = jnp.mean((z - m) ** 2, axis=0, keepdims=True)  # biased variance
        return (z - m) / jnp.sqrt(v + eps) * g + b

    za = p @ prm["wM1"].T + prm["bM1"]
    zc = p @ prm["wM2"].T + prm["bM2"]
    rea = jax.nn.softmax(bn(za @ prm["wG1"].T + prm["bG1"],
                            prm["g1"], prm["beta1"]), axis=1)
    rec = jax.nn.softmax(bn(zc @ prm["wG2"].T + prm["bG2"],
                            prm["g2"], prm["beta2"]), axis=1)
    return rea + rec


if __name__ == "__main__":
    B, dimZ, dimX = 8, 16, 32

    key = jax.random.PRNGKey(0)
    kp, k1, k2, k3, k4 = jax.random.split(key, 5)

    wM1, bM1 = _init_linear(k1, dimZ, dimZ)
    wM2, bM2 = _init_linear(k2, dimZ, dimZ)
    wG1, bG1 = _init_linear(k3, dimX, dimZ)
    wG2, bG2 = _init_linear(k4, dimX, dimZ)

    prm = {
        "wM1": wM1, "bM1": bM1, "wM2": wM2, "bM2": bM2,
        "wG1": wG1, "bG1": bG1, "wG2": wG2, "bG2": bG2,
        "g1": jnp.ones((dimX,), jnp.float32),
        "beta1": jnp.zeros((dimX,), jnp.float32),
        "g2": jnp.ones((dimX,), jnp.float32),
        "beta2": jnp.zeros((dimX,), jnp.float32),
    }
    p = jax.random.normal(kp, (B, dimZ), jnp.float32)

    recon_ref = _reference(p, prm)

    # f32 matmul path: tight check against the PyTorch-equivalent reference.
    packed_f32 = pack_decoder_params(prm, matmul_dtype=jnp.float32)
    recon = oivae_decoder(p, packed_f32)
    jax.block_until_ready(recon)
    assert jnp.allclose(recon, recon_ref, atol=1e-4, rtol=1e-4), \
        float(jnp.max(jnp.abs(recon - recon_ref)))

    # bf16 matmul-operand path (MXU-native on v5e/v6e/v7x): bf16 dot inputs,
    # f32 accumulate, f32 BN/softmax; loose tolerance for bf16 operand rounding.
    packed_bf16 = pack_decoder_params(prm, matmul_dtype=jnp.bfloat16)
    recon_bf16 = oivae_decoder(p, packed_bf16)
    jax.block_until_ready(recon_bf16)
    assert jnp.allclose(recon_bf16, recon_ref, atol=2e-2, rtol=2e-2), \
        float(jnp.max(jnp.abs(recon_bf16 - recon_ref)))

    print("KERNEL_OK")
</pallas_src>

<mosaic_0001>
module attributes {stable_mosaic.version = 11 : i64} {
  func.func @oivae_decoder_kernel(%arg0: memref<8x16xf32, #tpu.memory_space<vmem>>, %arg1: memref<16x32xf32, #tpu.memory_space<vmem>>, %arg2: memref<1x32xf32, #tpu.memory_space<vmem>>, %arg3: memref<32x64xf32, #tpu.memory_space<vmem>>, %arg4: memref<2x64xf32, #tpu.memory_space<vmem>>, %arg5: memref<8x32xf32, #tpu.memory_space<vmem>>) attributes {dimension_semantics = [], scalar_prefetch = 0 : i64, scratch_operands = 0 : i64, tpu.core_type = #tpu.core_type<tc>} {
    %c0 = arith.constant 0 : index
    %c0_0 = arith.constant 0 : index
    %0 = vector.load %arg0[%c0, %c0_0] : memref<8x16xf32, #tpu.memory_space<vmem>>, vector<8x16xf32>
    %c0_1 = arith.constant 0 : index
    %c0_2 = arith.constant 0 : index
    %1 = vector.load %arg1[%c0_1, %c0_2] : memref<16x32xf32, #tpu.memory_space<vmem>>, vector<16x32xf32>
    %cst = arith.constant dense<0.000000e+00> : vector<8x32xf32>
    %2 = tpu.matmul %0, %1, %cst {dimension_numbers = #tpu.dot_dimension_numbers<[1], [0], [0], [1], [0, 0, 1, 1], [], []>} : vector<8x16xf32>, vector<16x32xf32>, vector<8x32xf32> -> vector<8x32xf32>
    %c0_3 = arith.constant 0 : index
    %c0_4 = arith.constant 0 : index
    %3 = vector.load %arg2[%c0_3, %c0_4] : memref<1x32xf32, #tpu.memory_space<vmem>>, vector<1x32xf32>
    %4 = vector.broadcast %3 : vector<1x32xf32> to vector<8x32xf32>
    %5 = arith.addf %2, %4 : vector<8x32xf32>
    %c0_5 = arith.constant 0 : index
    %c0_6 = arith.constant 0 : index
    %6 = vector.load %arg3[%c0_5, %c0_6] : memref<32x64xf32, #tpu.memory_space<vmem>>, vector<32x64xf32>
    %cst_7 = arith.constant dense<0.000000e+00> : vector<8x64xf32>
    %7 = tpu.matmul %5, %6, %cst_7 {dimension_numbers = #tpu.dot_dimension_numbers<[1], [0], [0], [1], [0, 0, 1, 1], [], []>} : vector<8x32xf32>, vector<32x64xf32>, vector<8x64xf32> -> vector<8x64xf32>
    %cst_8 = arith.constant dense<0.000000e+00> : vector<64xf32>
    %8 = vector.multi_reduction <add>, %7, %cst_8 [0] : vector<8x64xf32> to vector<64xf32>
    %9 = vector.shape_cast %8 : vector<64xf32> to vector<1x64xf32>
    %cst_9 = arith.constant 1.250000e-01 : f32
    %10 = vector.broadcast %cst_9 : f32 to vector<1x64xf32>
    %11 = arith.mulf %9, %10 : vector<1x64xf32>
    %12 = arith.mulf %7, %7 : vector<8x64xf32>
    %cst_10 = arith.constant dense<0.000000e+00> : vector<64xf32>
    %13 = vector.multi_reduction <add>, %12, %cst_10 [0] : vector<8x64xf32> to vector<64xf32>
    %14 = vector.shape_cast %13 : vector<64xf32> to vector<1x64xf32>
    %cst_11 = arith.constant 1.250000e-01 : f32
    %15 = vector.broadcast %cst_11 : f32 to vector<1x64xf32>
    %16 = arith.mulf %14, %15 : vector<1x64xf32>
    %17 = arith.mulf %11, %11 : vector<1x64xf32>
    %18 = arith.subf %16, %17 : vector<1x64xf32>
    %c0_12 = arith.constant 0 : index
    %c0_13 = arith.constant 0 : index
    %19 = vector.load %arg4[%c0_12, %c0_13] : memref<2x64xf32, #tpu.memory_space<vmem>>, vector<2x64xf32>
    %20 = vector.extract_strided_slice %19 {offsets = [0, 0], sizes = [1, 64], strides = [1, 1]} : vector<2x64xf32> to vector<1x64xf32>
    %21 = vector.extract_strided_slice %19 {offsets = [1, 0], sizes = [1, 64], strides = [1, 1]} : vector<2x64xf32> to vector<1x64xf32>
    %22 = vector.broadcast %11 : vector<1x64xf32> to vector<8x64xf32>
    %23 = arith.subf %7, %22 : vector<8x64xf32>
    %cst_14 = arith.constant 9.99999974E-6 : f32
    %24 = vector.broadcast %cst_14 : f32 to vector<1x64xf32>
    %25 = arith.addf %18, %24 : vector<1x64xf32>
    %26 = math.rsqrt %25 : vector<1x64xf32>
    %27 = vector.broadcast %26 : vector<1x64xf32> to vector<8x64xf32>
    %28 = arith.mulf %23, %27 : vector<8x64xf32>
    %29 = vector.broadcast %20 : vector<1x64xf32> to vector<8x64xf32>
    %30 = arith.mulf %28, %29 : vector<8x64xf32>
    %31 = vector.broadcast %21 : vector<1x64xf32> to vector<8x64xf32>
    %32 = arith.addf %30, %31 : vector<8x64xf32>
    %33 = vector.extract_strided_slice %32 {offsets = [0, 0], sizes = [8, 32], strides = [1, 1]} : vector<8x64xf32> to vector<8x32xf32>
    %cst_15 = arith.constant dense<0xFF800000> : vector<8xf32>
    %34 = vector.multi_reduction <maximumf>, %33, %cst_15 [1] : vector<8x32xf32> to vector<8xf32>
    %35 = vector.shape_cast %34 : vector<8xf32> to vector<8x1xf32>
    %36 = vector.broadcast %35 : vector<8x1xf32> to vector<8x32xf32>
    %37 = arith.subf %33, %36 : vector<8x32xf32>
    %38 = math.exp %37 : vector<8x32xf32>
    %cst_16 = arith.constant dense<0.000000e+00> : vector<8xf32>
    %39 = vector.multi_reduction <add>, %38, %cst_16 [1] : vector<8x32xf32> to vector<8xf32>
    %40 = vector.shape_cast %39 : vector<8xf32> to vector<8x1xf32>
    %41 = vector.broadcast %40 : vector<8x1xf32> to vector<8x32xf32>
    %42 = arith.divf %38, %41 : vector<8x32xf32>
    %43 = vector.extract_strided_slice %32 {offsets = [0, 32], sizes = [8, 32], strides = [1, 1]} : vector<8x64xf32> to vector<8x32xf32>
    %cst_17 = arith.constant dense<0xFF800000> : vector<8xf32>
    %44 = vector.multi_reduction <maximumf>, %43, %cst_17 [1] : vector<8x32xf32> to vector<8xf32>
    %45 = vector.shape_cast %44 : vector<8xf32> to vector<8x1xf32>
    %46 = vector.broadcast %45 : vector<8x1xf32> to vector<8x32xf32>
    %47 = arith.subf %43, %46 : vector<8x32xf32>
    %48 = math.exp %47 : vector<8x32xf32>
    %cst_18 = arith.constant dense<0.000000e+00> : vector<8xf32>
    %49 = vector.multi_reduction <add>, %48, %cst_18 [1] : vector<8x32xf32> to vector<8xf32>
    %50 = vector.shape_cast %49 : vector<8xf32> to vector<8x1xf32>
    %51 = vector.broadcast %50 : vector<8x1xf32> to vector<8x32xf32>
    %52 = arith.divf %48, %51 : vector<8x32xf32>
    %53 = arith.addf %42, %52 : vector<8x32xf32>
    %c0_19 = arith.constant 0 : index
    %c0_20 = arith.constant 0 : index
    %54 = vector.load %arg5[%c0_19, %c0_20] : memref<8x32xf32, #tpu.memory_space<vmem>>, vector<8x32xf32>
    tpu.vector_store %arg5[%c0_19, %c0_20], %53 {strides = array<i32>} : memref<8x32xf32, #tpu.memory_space<vmem>>, vector<8x32xf32>,
    return
  }
}

</mosaic_0001>

<bundles_post_ra>
// kernel: tpu_custom_call.1
= control target key start
LH: loop header
LB: loop body
LE: loop exit
PB: predicated region body
PF: predicated region fallthrough
CT: control target
= control target key end

     0   :  { %10 = vsyncpa [#allocation3], 0  ;;  %s422_s0 = inlined_call_operand.hbm [shape: f32[8,16], index: 0, kind: input, shape index: {}]   ;;  %s423_s1 = inlined_call_operand.hbm [shape: f32[16,32], index: 1, kind: input, shape index: {}]   ;;  %s424_s2 = inlined_call_operand.vmem [shape: f32[1,32], index: 2, kind: input, shape index: {}]   ;;  %s425_s3 = inlined_call_operand.hbm [shape: f32[32,64], index: 3, kind: input, shape index: {}]   ;;  %s426_s4 = inlined_call_operand.vmem [shape: f32[2,64], index: 4, kind: input, shape index: {}]   ;;  %s427_s5 = inlined_call_operand.hbm [shape: f32[8,32], index: 5, kind: output, shape index: {}]  }
   0x1   :  { %11 = vsyncpa [#allocation6], 0  ;;  %s28_s20 = sshll.u32 %s423_s1, 4  ;;  %s29_s20 = int_to_ptr.hbm [resolvable:$true] %s28_s20 }
   0x2   :  { %12 = vsyncpa [#allocation4], 0  ;;  %s362_s21 = smov [#allocation5]   ;;  %s18_s25 = sshll.u32 %s422_s0, 4  ;;  %s19_s25 = int_to_ptr.hbm [resolvable:$true] %s18_s25 }
   0x3   :  { %s30_s22 = sshll.u32 %s362_s21, 4  ;;  %s363_s26 = smov 128   ;;  %s31_s22 = int_to_ptr.vmem [resolvable:$true] %s30_s22 }
   0x4   :  { %s364_s27 = smov 8   ;;  %s365_s28 = smov [#allocation2]  }
   0x5   :  { %36 = dma.hbm_to_vmem [thread:$0]  %s29_s20, 256, %s31_s22, [#allocation6], %s363_s26, %s363_s26, %s364_s27  }
   0x6   :  { %s20_s29 = sshll.u32 %s365_s28, 4  ;;  %s43_s7 = sshll.u32 %s425_s3, 4  ;;  %s21_s29 = int_to_ptr.vmem [resolvable:$true] %s20_s29  ;;  %s44_s7 = int_to_ptr.hbm [resolvable:$true] %s43_s7 }
   0x7   :  { %23 = dma.hbm_to_vmem [thread:$0]  %s19_s25, 128, %s21_s29, [#allocation3]  }
   0x8   :  { %s366_s1 = smov [#allocation7]  }
   0x9   :  { %s45_s8 = sshll.u32 %s366_s1, 4  ;;  %s46_s8 = int_to_ptr.vmem [resolvable:$true] %s45_s8 }
   0xa   :  { %51 = dma.hbm_to_vmem [thread:$0]  %s44_s7, 512, %s46_s8, [#allocation6], %s363_s26, %s363_s26, %s364_s27  }
   0xb   :  { %356 = dma.done.wait [#allocation3], 128  }
   0xc   :  { %357 = vsyncadd [#allocation3], 4294967168 }
   0xd   :  { %358 = dma.done.wait [#allocation6], 768  }
   0xe   :  { %359 = vsyncadd [#allocation6], 4294966528  ;;  %v68_v0 = vld [vmem:[#allocation5 + $0x8] sm:$0xff]  ;;  %v67_v1 = vld [vmem:[#allocation5] sm:$0xff]  ;;  %vm73_vm0 = vcmask 130048   ;;  %vm101_vm1 = vcmask 261120  }
   0xf   :  { %v66_v2 = vld [vmem:[#allocation2] sm:$0xff]  ;;  %91 = vmatpush.msra.mxu0 %v68_v0  ;;  %v100_v3 = vld [vmem:[#allocation7 + $0x18] sm:$0xff]  ;;  %v99_v4 = vld [vmem:[#allocation7 + $0x10] sm:$0xff]  ;;  %vm125_vm2 = vcmask 523264   ;;  %vm187_vm6 = vcmask 523520   ;;  %s368_s10 = smov [#allocation8]  }
  0x10   :  { %117 = vmatpush.msra.mxu1 %v100_v3  ;;  %v98_v5 = vld [vmem:[#allocation7 + $0x8] sm:$0xff]  ;;  %v97_v6 = vld [vmem:[#allocation7] sm:$0xff]  ;;  %s227_s11 = sshll.u32 %s368_s10, 4  ;;  %s229_s14 = sshll.u32 %s427_s5, 4  ;;  %s228_s11 = int_to_ptr.vmem [resolvable:$true] %s227_s11  ;;  %s230_s14 = int_to_ptr.hbm [resolvable:$true] %s229_s14 }
  0x11   :  { %92 = vmatpush.msra.mxu0 %v67_v1  ;;  %v249_v7 = vld [vmem:[%s424_s2] ss:$0 sm:$0xff] }
  0x12   :  { %240 = vmatmul.msk.f32.vlgmr.msra.gmra.mxu0 %vm73_vm0, %v66_v2  ;;  %118 = vmatpush.msra.mxu1 %v99_v4  ;;  %v145_v35 = vld [vmem:[%s426_s4] sm:$0x3]  ;;  %s367_s4 = smov 96  }
  0x13   :  { %v159_v39 = vperm.slane %v145_v35, 0  ;;  %v161_v42 = vperm.slane %v145_v35, 1 }
  0x14   :  { %119 = vmatpush.msra.mxu1 %v98_v5 }
  0x16   :  { %120 = vmatpush.msra.mxu1 %v97_v6 }
  0x8f   :  { %v94_v8 = vpop.f32.mrf.mxu0 }
  0x90   :  { %v95_v9 = vadd.f32 %v249_v7, %v94_v8 }
  0x92   :  { %241 = vmatmul.msk.f32.vlgmr.msra.gmra.mxu1 %vm101_vm1, %v95_v9 }
 0x10f   :  { %v122_v10 = vpop.f32.mrf.mxu1 }
 0x110   :  { %v126_v11 = vsel %vm125_vm2, %v122_v10, 0.0  ;;  %v134_v12 = vmul.f32 %v122_v10, %v122_v10 }
 0x111   :  { %v127_v13 = vrot.slane %v126_v11, 4 }
 0x112   :  { %v135_v14 = vsel %vm125_vm2, %v134_v12, 0.0 }
 0x113   :  { %v128_v15 = vadd.f32 %v127_v13, %v126_v11  ;;  %v136_v16 = vrot.slane %v135_v14, 4 }
 0x115   :  { %v129_v17 = vrot.slane %v128_v15, 2  ;;  %v137_v18 = vadd.f32 %v136_v16, %v135_v14 }
 0x117   :  { %v130_v19 = vadd.f32 %v129_v17, %v128_v15  ;;  %v138_v20 = vrot.slane %v137_v18, 2 }
 0x119   :  { %v131_v21 = vrot.slane %v130_v19, 1  ;;  %v139_v22 = vadd.f32 %v138_v20, %v137_v18 }
 0x11b   :  { %v132_v23 = vadd.f32 %v131_v21, %v130_v19  ;;  %v140_v24 = vrot.slane %v139_v22, 1 }
 0x11d   :  { %v133_v25 = vmul.f32 0.125, %v132_v23  ;;  %v141_v26 = vadd.f32 %v140_v24, %v139_v22 }
 0x11f   :  { %v142_v27 = vmul.f32 0.125, %v141_v26  ;;  %v143_v28 = vmul.f32 %v133_v25, %v133_v25  ;;  %v146_v38 = vsub.f32 %v122_v10, %v133_v25 }
 0x121   :  { %v144_v29 = vsub.f32 %v142_v27, %v143_v28 }
 0x123   :  { %v147_v30 = vadd.f32 1e-05, %v144_v29 }
 0x125   :  { %250 = vrsqrt.f32 %v147_v30  ;;  %vm154_vm4 = vweird.f32 %v147_v30 }
 0x12b   :  { %v251_v31 = vpop.eup %250 }
 0x12c   :  { %v149_v32 = vmul.f32 %v251_v31, %v147_v30  ;;  %vm155_vm3 = vweird.f32 %v251_v31 }
 0x12d   :  { %vm156_vm5 = vmor %vm154_vm4, %vm155_vm3 }
 0x12e   :  { %v150_v33 = vmul.f32 %v251_v31, %v149_v32 }
 0x130   :  { %v151_v34 = vmul.f32 0.5, %v150_v33 }
 0x132   :  { %v152_v36 = vsub.f32 1.5, %v151_v34 }
 0x134   :  { %v153_v37 = vmul.f32 %v251_v31, %v152_v36 }
 0x136   :  { %v157_v40 = vsel %vm156_vm5, %v251_v31, %v153_v37 }
 0x137   :  { %v158_v41 = vmul.f32 %v157_v40, %v146_v38 }
 0x139   :  { %v160_v43 = vmul.f32 %v159_v39, %v158_v41 }
 0x13b   :  { %v162_v44 = vadd.f32 %v161_v42, %v160_v43 }
 0x13d   :  { %v188_v45 = vsel %vm187_vm6, %v162_v44, -inf  ;;  %v163_v46 = vsel %vm101_vm1, %v162_v44, -inf }
 0x13e   :  { %189 = vmax.xlane.f32.xlu0 %v188_v45  ;;  %164 = vmax.xlane.f32.xlu1 %v163_v46 }
 0x1b1   :  { %v190_v47 = vpop.xlane.xlu0 %189  ;;  %v165_v48 = vpop.xlane.xlu1 %164 }
 0x1b2   :  { %v191_v49 = vsub.f32 %v162_v44, %v190_v47  ;;  %v166_v50 = vsub.f32 %v162_v44, %v165_v48 }
 0x1b4   :  { %v192_v51 = vmul.f32 1.442695, %v191_v49  ;;  %v167_v52 = vmul.f32 1.442695, %v166_v50 }
 0x1b6   :  { %252 = vpow2.f32 %v192_v51 }
 0x1b7   :  { %254 = vpow2.f32 %v167_v52 }
 0x1bc   :  { %v253_v53 = vpop.eup %252 }
 0x1bd   :  { %v255_v54 = vpop.eup %254  ;;  %195 = vrot.lane.b32.xlu0 %v253_v53, %s367_s4 }
 0x1be   :  { %v169_v55 = vsel %vm101_vm1, %v255_v54, 0.0 }
 0x1bf   :  { %170 = vadd.xlane.f32.xlu2 %v169_v55 }
 0x22f   :  { %v196_v56 = vpop.permute.xlu0 %195 }
 0x230   :  { %v198_v57 = vsel %vm101_vm1, %v196_v56, 0.0 }
 0x231   :  { %199 = vadd.xlane.f32.xlu1 %v198_v57 }
 0x232   :  { %v171_v6 = vpop.xlane.xlu2 %170 }
 0x233   :  { %v183_v12 = vand.u32 2147483648, %v171_v6  ;;  %vm177_vm12 = vweird.f32 %v171_v6  ;;  %v181_v13 = vand.u32 2147483647, %v171_v6 }
 0x235   :  { %v184_v15 = vor.u32 1.1754944e-38, %v183_v12  ;;  %vm182_vm14 = vcmp.eq.f32.partialorder %v181_v13, 8.507059e+37 }
 0x2a4   :  { %v200_v58 = vpop.xlane.xlu1 %199 }
 0x2a5   :  { %256 = vrcp.f32 %v200_v58  ;;  %v212_v62 = vand.u32 2147483648, %v200_v58  ;;  %v210_v0 = vand.u32 2147483647, %v200_v58  ;;  %vm206_vm8 = vweird.f32 %v200_v58 }
 0x2a6   :  { %258 = vrcp.f32 %v171_v6 }
 0x2a7   :  { %v213_v2 = vor.u32 1.1754944e-38, %v212_v62  ;;  %vm211_vm10 = vcmp.eq.f32.partialorder %v210_v0, 8.507059e+37 }
 0x2ab   :  { %v257_v59 = vpop.eup %256 }
 0x2ac   :  { %v202_v60 = vmul.f32 %v257_v59, %v200_v58  ;;  %vm207_vm7 = vweird.f32 %v257_v59  ;;  %v259_v7 = vpop.eup %258 }
 0x2ad   :  { %vm208_vm9 = vmor %vm206_vm8, %vm207_vm7  ;;  %v173_v8 = vmul.f32 %v259_v7, %v171_v6  ;;  %vm178_vm11 = vweird.f32 %v259_v7 }
 0x2ae   :  { %v203_v61 = vsub.f32 1.0, %v202_v60  ;;  %vm179_vm13 = vmor %vm177_vm12, %vm178_vm11 }
 0x2af   :  { %v174_v9 = vsub.f32 1.0, %v173_v8 }
 0x2b0   :  { %v204_v63 = vmul.f32 %v257_v59, %v203_v61 }
 0x2b1   :  { %v175_v10 = vmul.f32 %v259_v7, %v174_v9 }
 0x2b2   :  { %v205_v1 = vadd.f32 %v257_v59, %v204_v63 }
 0x2b3   :  { %v176_v11 = vadd.f32 %v259_v7, %v175_v10 }
 0x2b4   :  { %v209_v3 = vsel %vm208_vm9, %v257_v59, %v205_v1 }
 0x2b5   :  { %v214_v4 = vsel %vm211_vm10, %v213_v2, %v209_v3  ;;  %v180_v14 = vsel %vm179_vm13, %v259_v7, %v176_v11 }
 0x2b6   :  { %v215_v5 = vmul.f32 %v253_v53, %v214_v4  ;;  %v185_v16 = vsel %vm182_vm14, %v184_v15, %v180_v14 }
 0x2b7   :  { %v186_v17 = vmul.f32 %v255_v54, %v185_v16 }
 0x2b8   :  { %217 = vrot.lane.b32.xlu2 %v215_v5, %s367_s4 }
 0x312   :  { %v218_v18 = vpop.permute.xlu2 %217 }
 0x313   :  { %v220_v19 = vadd.f32 %v218_v18, %v186_v17 }
 0x315   :  { %221 = vst.msk [vmem:[#allocation8] sm:$0xff] %vm101_vm1, %v220_v19 }
 0x316   :  { %232 = dma.vmem_to_hbm [thread:$0]  %s228_s11, 128, %s230_s14, [#allocation4]  }
 0x317   :  { %360 = dma.done.wait [#allocation4], 128  }
 0x318   :  { %361 = vsyncadd [#allocation4], 4294967168 }
 0x319   :  { %237 = vsyncpa [#allocation3], 1 }
 0x31a   :  { %238 = vsyncpa [#allocation6], 1 }
 0x31b   :  { %239 = vsyncpa [#allocation4], 1 }

</bundles_post_ra>
